<compile_context>
chip_gen: v7x
topology: tpu7x:2x2x1
jax: 0.10.0
libtpu: 0.0.40
codegen_flags: <defaults>
</compile_context>

<pallas_src>
import jax
import jax.numpy as jnp
from jax.experimental import pallas as pl
from jax.experimental.pallas import tpu as pltpu

S, B, C = 7, 2, 20  # YoloLoss defaults


def _round_up(x, m):
    return ((x + m - 1) // m) * m


def yolo_iou_kernel(slab_ref, ioumax_ref, best_ref):
    # slab planes: 0..3 = pred box1 (x,y,w,h), 4..7 = pred box2, 8..11 = target.
    tx, ty, tw, th = slab_ref[8], slab_ref[9], slab_ref[10], slab_ref[11]

    # Target corners & area: computed once, shared by both IOU evaluations.
    t_x1 = tx - tw * 0.5
    t_y1 = ty - th * 0.5
    t_x2 = tx + tw * 0.5
    t_y2 = ty + th * 0.5
    t_area = jnp.abs((t_x2 - t_x1) * (t_y2 - t_y1))

    def iou(px, py, pw, ph):
        p_x1 = px - pw * 0.5
        p_y1 = py - ph * 0.5
        p_x2 = px + pw * 0.5
        p_y2 = py + ph * 0.5
        x1 = jnp.maximum(p_x1, t_x1)
        y1 = jnp.maximum(p_y1, t_y1)
        x2 = jnp.minimum(p_x2, t_x2)
        y2 = jnp.minimum(p_y2, t_y2)
        inter = jnp.maximum(x2 - x1, 0.0) * jnp.maximum(y2 - y1, 0.0)
        p_area = jnp.abs((p_x2 - p_x1) * (p_y2 - p_y1))
        # Exact division; association matches the torch reference.
        return inter / (p_area + t_area - inter + 1e-6)

    iou1 = iou(slab_ref[0], slab_ref[1], slab_ref[2], slab_ref[3])
    iou2 = iou(slab_ref[4], slab_ref[5], slab_ref[6], slab_ref[7])

    # torch.max(ious, dim=0): first index wins ties -> box 2 only if strictly greater.
    best = iou2 > iou1
    ioumax_ref[...] = jnp.where(best, iou2, iou1)
    best_ref[...] = best.astype(jnp.int8)


def yolo_loss_forward(predictions, target, *, tile_rows=512):
    """predictions: (N, S*S*(C+B*5)) or any shape reshapeable to it.
       target:      (N, S, S, C+B*5).
       Returns (iou_maxes, bestbox) with shapes (N, S, S, 1)."""
    D = C + B * 5
    preds = predictions.reshape(-1, S, S, D).astype(jnp.float32)
    target = target.astype(jnp.float32)
    N = preds.shape[0]
    M = N * S * S

    # Single gather of the 12 box channels -> coordinate-major dense slab.
    slab = jnp.concatenate(
        [preds[..., 21:25], preds[..., 26:30], target[..., 21:25]], axis=-1
    ).reshape(M, 12).T                                        # (12, M)

    rows = _round_up(M, 128) // 128                           # ceil(M / 128)
    tile_r = min(_round_up(max(tile_rows, 8), 8), _round_up(rows, 8))
    r_pad = _round_up(rows, tile_r)
    m_pad = r_pad * 128

    slab = jnp.pad(slab, ((0, 0), (0, m_pad - M))).reshape(12, r_pad, 128)

    grid = (r_pad // tile_r,)
    in_spec = pl.BlockSpec((12, tile_r, 128), lambda i: (0, i, 0))
    out_spec = pl.BlockSpec((tile_r, 128), lambda i: (i, 0))

    iou_max, best = pl.pallas_call(
        yolo_iou_kernel,
        out_shape=(
            jax.ShapeDtypeStruct((r_pad, 128), jnp.float32),
            jax.ShapeDtypeStruct((r_pad, 128), jnp.int8),
        ),
        grid=grid,
        in_specs=[in_spec],
        out_specs=(out_spec, out_spec),
        compiler_params=pltpu.CompilerParams(
            dimension_semantics=("parallel",)),
    )(slab)

    iou_maxes = iou_max.reshape(-1)[:M].reshape(N, S, S, 1)
    bestbox = best.reshape(-1)[:M].astype(jnp.int32).reshape(N, S, S, 1)
    return iou_maxes, bestbox


def _reference(predictions, target):
    """Pure-JAX reference mirroring the PyTorch code (for a sanity check)."""
    D = C + B * 5
    preds = predictions.reshape(-1, S, S, D)

    def iou(p, t):
        b1x1 = p[..., 0:1] - p[..., 2:3] / 2
        b1y1 = p[..., 1:2] - p[..., 3:4] / 2
        b1x2 = p[..., 0:1] + p[..., 2:3] / 2
        b1y2 = p[..., 1:2] + p[..., 3:4] / 2
        b2x1 = t[..., 0:1] - t[..., 2:3] / 2
        b2y1 = t[..., 1:2] - t[..., 3:4] / 2
        b2x2 = t[..., 0:1] + t[..., 2:3] / 2
        b2y2 = t[..., 1:2] + t[..., 3:4] / 2
        x1 = jnp.maximum(b1x1, b2x1)
        y1 = jnp.maximum(b1y1, b2y1)
        x2 = jnp.minimum(b1x2, b2x2)
        y2 = jnp.minimum(b1y2, b2y2)
        inter = jnp.clip(x2 - x1, 0) * jnp.clip(y2 - y1, 0)
        a1 = jnp.abs((b1x2 - b1x1) * (b1y2 - b1y1))
        a2 = jnp.abs((b2x2 - b2x1) * (b2y2 - b2y1))
        return inter / (a1 + a2 - inter + 1e-6)

    iou_b1 = iou(preds[..., 21:25], target[..., 21:25])
    iou_b2 = iou(preds[..., 26:30], target[..., 21:25])
    ious = jnp.stack([iou_b1, iou_b2], axis=0)
    return (jnp.max(ious, axis=0), jnp.argmax(ious, axis=0).astype(jnp.int32),
            iou_b1, iou_b2)


def _check(iou_maxes, bestbox, ref):
    ref_iou, ref_best, iou_b1, iou_b2 = ref
    assert iou_maxes.shape == ref_iou.shape and bestbox.shape == ref_best.shape
    assert jnp.allclose(iou_maxes, ref_iou, atol=1e-5, rtol=1e-5)
    # argmax must match torch.max wherever the two IOUs are not a floating-point
    # near-tie (argmax at exact ties is representation/order dependent).
    decisive = jnp.abs(iou_b1 - iou_b2) > 1e-6
    assert bool(jnp.all(jnp.where(decisive, bestbox == ref_best, True)))


if __name__ == "__main__":
    key = jax.random.PRNGKey(0)
    k1, k2, k3, k4 = jax.random.split(key, 4)

    D = C + B * 5  # 30

    # Default small check (N=2 -> 98 cells, single grid step).
    N1 = 2
    preds1 = jax.random.uniform(k1, (N1, S * S * D), dtype=jnp.float32)
    targ1 = jax.random.uniform(k2, (N1, S, S, D), dtype=jnp.float32)
    iou_maxes, bestbox = yolo_loss_forward(preds1, targ1)
    jax.block_until_ready((iou_maxes, bestbox))
    _check(iou_maxes, bestbox, _reference(preds1, targ1))

    # Larger check with a forced multi-block grid (exercises tiling + padding).
    N2 = 32
    preds2 = jax.random.uniform(k3, (N2, S * S * D), dtype=jnp.float32)
    targ2 = jax.random.uniform(k4, (N2, S, S, D), dtype=jnp.float32)
    iou2, best2 = yolo_loss_forward(preds2, targ2, tile_rows=8)
    jax.block_until_ready((iou2, best2))
    _check(iou2, best2, _reference(preds2, targ2))

    print("KERNEL_OK")
</pallas_src>

<mosaic_0001>
module attributes {stable_mosaic.version = 11 : i64} {
  func.func @yolo_iou_kernel(%arg0: i32, %arg1: memref<12x8x128xf32, #tpu.memory_space<vmem>>, %arg2: memref<8x128xf32, #tpu.memory_space<vmem>>, %arg3: memref<8x128xi8, #tpu.memory_space<vmem>>) attributes {dimension_semantics = [#tpu.dimension_semantics<parallel>], iteration_bounds = array<i64: 1>, scalar_prefetch = 0 : i64, scratch_operands = 0 : i64, tpu.core_type = #tpu.core_type<tc>, window_params = [{transform_indices = @transform_0, window_bounds = array<i64: 12, 8, 128>}, {transform_indices = @transform_1, window_bounds = array<i64: 8, 128>}, {transform_indices = @transform_2, window_bounds = array<i64: 8, 128>}]} {
    %c8 = arith.constant 8 : index
    %c0 = arith.constant 0 : index
    %c0_0 = arith.constant 0 : index
    %0 = vector.load %arg1[%c8, %c0, %c0_0] : memref<12x8x128xf32, #tpu.memory_space<vmem>>, vector<1x8x128xf32>
    %1 = vector.shape_cast %0 : vector<1x8x128xf32> to vector<8x128xf32>
    %c9 = arith.constant 9 : index
    %c0_1 = arith.constant 0 : index
    %c0_2 = arith.constant 0 : index
    %2 = vector.load %arg1[%c9, %c0_1, %c0_2] : memref<12x8x128xf32, #tpu.memory_space<vmem>>, vector<1x8x128xf32>
    %3 = vector.shape_cast %2 : vector<1x8x128xf32> to vector<8x128xf32>
    %c10 = arith.constant 10 : index
    %c0_3 = arith.constant 0 : index
    %c0_4 = arith.constant 0 : index
    %4 = vector.load %arg1[%c10, %c0_3, %c0_4] : memref<12x8x128xf32, #tpu.memory_space<vmem>>, vector<1x8x128xf32>
    %5 = vector.shape_cast %4 : vector<1x8x128xf32> to vector<8x128xf32>
    %c11 = arith.constant 11 : index
    %c0_5 = arith.constant 0 : index
    %c0_6 = arith.constant 0 : index
    %6 = vector.load %arg1[%c11, %c0_5, %c0_6] : memref<12x8x128xf32, #tpu.memory_space<vmem>>, vector<1x8x128xf32>
    %7 = vector.shape_cast %6 : vector<1x8x128xf32> to vector<8x128xf32>
    %cst = arith.constant 5.000000e-01 : f32
    %8 = vector.broadcast %cst : f32 to vector<8x128xf32>
    %9 = arith.mulf %5, %8 : vector<8x128xf32>
    %10 = arith.subf %1, %9 : vector<8x128xf32>
    %cst_7 = arith.constant 5.000000e-01 : f32
    %11 = vector.broadcast %cst_7 : f32 to vector<8x128xf32>
    %12 = arith.mulf %7, %11 : vector<8x128xf32>
    %13 = arith.subf %3, %12 : vector<8x128xf32>
    %cst_8 = arith.constant 5.000000e-01 : f32
    %14 = vector.broadcast %cst_8 : f32 to vector<8x128xf32>
    %15 = arith.mulf %5, %14 : vector<8x128xf32>
    %16 = arith.addf %1, %15 : vector<8x128xf32>
    %cst_9 = arith.constant 5.000000e-01 : f32
    %17 = vector.broadcast %cst_9 : f32 to vector<8x128xf32>
    %18 = arith.mulf %7, %17 : vector<8x128xf32>
    %19 = arith.addf %3, %18 : vector<8x128xf32>
    %20 = arith.subf %16, %10 : vector<8x128xf32>
    %21 = arith.subf %19, %13 : vector<8x128xf32>
    %22 = arith.mulf %20, %21 : vector<8x128xf32>
    %23 = math.absf %22 : vector<8x128xf32>
    %c0_10 = arith.constant 0 : index
    %c0_11 = arith.constant 0 : index
    %c0_12 = arith.constant 0 : index
    %24 = vector.load %arg1[%c0_10, %c0_11, %c0_12] : memref<12x8x128xf32, #tpu.memory_space<vmem>>, vector<1x8x128xf32>
    %25 = vector.shape_cast %24 : vector<1x8x128xf32> to vector<8x128xf32>
    %c1 = arith.constant 1 : index
    %c0_13 = arith.constant 0 : index
    %c0_14 = arith.constant 0 : index
    %26 = vector.load %arg1[%c1, %c0_13, %c0_14] : memref<12x8x128xf32, #tpu.memory_space<vmem>>, vector<1x8x128xf32>
    %27 = vector.shape_cast %26 : vector<1x8x128xf32> to vector<8x128xf32>
    %c2 = arith.constant 2 : index
    %c0_15 = arith.constant 0 : index
    %c0_16 = arith.constant 0 : index
    %28 = vector.load %arg1[%c2, %c0_15, %c0_16] : memref<12x8x128xf32, #tpu.memory_space<vmem>>, vector<1x8x128xf32>
    %29 = vector.shape_cast %28 : vector<1x8x128xf32> to vector<8x128xf32>
    %c3 = arith.constant 3 : index
    %c0_17 = arith.constant 0 : index
    %c0_18 = arith.constant 0 : index
    %30 = vector.load %arg1[%c3, %c0_17, %c0_18] : memref<12x8x128xf32, #tpu.memory_space<vmem>>, vector<1x8x128xf32>
    %31 = vector.shape_cast %30 : vector<1x8x128xf32> to vector<8x128xf32>
    %cst_19 = arith.constant 5.000000e-01 : f32
    %32 = vector.broadcast %cst_19 : f32 to vector<8x128xf32>
    %33 = arith.mulf %29, %32 : vector<8x128xf32>
    %34 = arith.subf %25, %33 : vector<8x128xf32>
    %cst_20 = arith.constant 5.000000e-01 : f32
    %35 = vector.broadcast %cst_20 : f32 to vector<8x128xf32>
    %36 = arith.mulf %31, %35 : vector<8x128xf32>
    %37 = arith.subf %27, %36 : vector<8x128xf32>
    %cst_21 = arith.constant 5.000000e-01 : f32
    %38 = vector.broadcast %cst_21 : f32 to vector<8x128xf32>
    %39 = arith.mulf %29, %38 : vector<8x128xf32>
    %40 = arith.addf %25, %39 : vector<8x128xf32>
    %cst_22 = arith.constant 5.000000e-01 : f32
    %41 = vector.broadcast %cst_22 : f32 to vector<8x128xf32>
    %42 = arith.mulf %31, %41 : vector<8x128xf32>
    %43 = arith.addf %27, %42 : vector<8x128xf32>
    %44 = arith.maximumf %34, %10 : vector<8x128xf32>
    %45 = arith.maximumf %37, %13 : vector<8x128xf32>
    %46 = arith.minimumf %40, %16 : vector<8x128xf32>
    %47 = arith.minimumf %43, %19 : vector<8x128xf32>
    %48 = arith.subf %46, %44 : vector<8x128xf32>
    %cst_23 = arith.constant 0.000000e+00 : f32
    %49 = vector.broadcast %cst_23 : f32 to vector<8x128xf32>
    %50 = arith.maximumf %48, %49 : vector<8x128xf32>
    %51 = arith.subf %47, %45 : vector<8x128xf32>
    %cst_24 = arith.constant 0.000000e+00 : f32
    %52 = vector.broadcast %cst_24 : f32 to vector<8x128xf32>
    %53 = arith.maximumf %51, %52 : vector<8x128xf32>
    %54 = arith.mulf %50, %53 : vector<8x128xf32>
    %55 = arith.subf %40, %34 : vector<8x128xf32>
    %56 = arith.subf %43, %37 : vector<8x128xf32>
    %57 = arith.mulf %55, %56 : vector<8x128xf32>
    %58 = math.absf %57 : vector<8x128xf32>
    %59 = arith.addf %58, %23 : vector<8x128xf32>
    %60 = arith.subf %59, %54 : vector<8x128xf32>
    %cst_25 = arith.constant 9.99999997E-7 : f32
    %61 = vector.broadcast %cst_25 : f32 to vector<8x128xf32>
    %62 = arith.addf %60, %61 : vector<8x128xf32>
    %63 = arith.divf %54, %62 : vector<8x128xf32>
    %c4 = arith.constant 4 : index
    %c0_26 = arith.constant 0 : index
    %c0_27 = arith.constant 0 : index
    %64 = vector.load %arg1[%c4, %c0_26, %c0_27] : memref<12x8x128xf32, #tpu.memory_space<vmem>>, vector<1x8x128xf32>
    %65 = vector.shape_cast %64 : vector<1x8x128xf32> to vector<8x128xf32>
    %c5 = arith.constant 5 : index
    %c0_28 = arith.constant 0 : index
    %c0_29 = arith.constant 0 : index
    %66 = vector.load %arg1[%c5, %c0_28, %c0_29] : memref<12x8x128xf32, #tpu.memory_space<vmem>>, vector<1x8x128xf32>
    %67 = vector.shape_cast %66 : vector<1x8x128xf32> to vector<8x128xf32>
    %c6 = arith.constant 6 : index
    %c0_30 = arith.constant 0 : index
    %c0_31 = arith.constant 0 : index
    %68 = vector.load %arg1[%c6, %c0_30, %c0_31] : memref<12x8x128xf32, #tpu.memory_space<vmem>>, vector<1x8x128xf32>
    %69 = vector.shape_cast %68 : vector<1x8x128xf32> to vector<8x128xf32>
    %c7 = arith.constant 7 : index
    %c0_32 = arith.constant 0 : index
    %c0_33 = arith.constant 0 : index
    %70 = vector.load %arg1[%c7, %c0_32, %c0_33] : memref<12x8x128xf32, #tpu.memory_space<vmem>>, vector<1x8x128xf32>
    %71 = vector.shape_cast %70 : vector<1x8x128xf32> to vector<8x128xf32>
    %cst_34 = arith.constant 5.000000e-01 : f32
    %72 = vector.broadcast %cst_34 : f32 to vector<8x128xf32>
    %73 = arith.mulf %69, %72 : vector<8x128xf32>
    %74 = arith.subf %65, %73 : vector<8x128xf32>
    %cst_35 = arith.constant 5.000000e-01 : f32
    %75 = vector.broadcast %cst_35 : f32 to vector<8x128xf32>
    %76 = arith.mulf %71, %75 : vector<8x128xf32>
    %77 = arith.subf %67, %76 : vector<8x128xf32>
    %cst_36 = arith.constant 5.000000e-01 : f32
    %78 = vector.broadcast %cst_36 : f32 to vector<8x128xf32>
    %79 = arith.mulf %69, %78 : vector<8x128xf32>
    %80 = arith.addf %65, %79 : vector<8x128xf32>
    %cst_37 = arith.constant 5.000000e-01 : f32
    %81 = vector.broadcast %cst_37 : f32 to vector<8x128xf32>
    %82 = arith.mulf %71, %81 : vector<8x128xf32>
    %83 = arith.addf %67, %82 : vector<8x128xf32>
    %84 = arith.maximumf %74, %10 : vector<8x128xf32>
    %85 = arith.maximumf %77, %13 : vector<8x128xf32>
    %86 = arith.minimumf %80, %16 : vector<8x128xf32>
    %87 = arith.minimumf %83, %19 : vector<8x128xf32>
    %88 = arith.subf %86, %84 : vector<8x128xf32>
    %cst_38 = arith.constant 0.000000e+00 : f32
    %89 = vector.broadcast %cst_38 : f32 to vector<8x128xf32>
    %90 = arith.maximumf %88, %89 : vector<8x128xf32>
    %91 = arith.subf %87, %85 : vector<8x128xf32>
    %cst_39 = arith.constant 0.000000e+00 : f32
    %92 = vector.broadcast %cst_39 : f32 to vector<8x128xf32>
    %93 = arith.maximumf %91, %92 : vector<8x128xf32>
    %94 = arith.mulf %90, %93 : vector<8x128xf32>
    %95 = arith.subf %80, %74 : vector<8x128xf32>
    %96 = arith.subf %83, %77 : vector<8x128xf32>
    %97 = arith.mulf %95, %96 : vector<8x128xf32>
    %98 = math.absf %97 : vector<8x128xf32>
    %99 = arith.addf %98, %23 : vector<8x128xf32>
    %100 = arith.subf %99, %94 : vector<8x128xf32>
    %cst_40 = arith.constant 9.99999997E-7 : f32
    %101 = vector.broadcast %cst_40 : f32 to vector<8x128xf32>
    %102 = arith.addf %100, %101 : vector<8x128xf32>
    %103 = arith.divf %94, %102 : vector<8x128xf32>
    %104 = arith.cmpf ogt, %103, %63 : vector<8x128xf32>
    %105 = arith.select %104, %103, %63 : vector<8x128xi1>, vector<8x128xf32>
    %c0_41 = arith.constant 0 : index
    %c0_42 = arith.constant 0 : index
    %106 = vector.load %arg2[%c0_41, %c0_42] : memref<8x128xf32, #tpu.memory_space<vmem>>, vector<8x128xf32>
    tpu.vector_store %arg2[%c0_41, %c0_42], %105 {strides = array<i32>} : memref<8x128xf32, #tpu.memory_space<vmem>>, vector<8x128xf32>,
    %107 = arith.extui %104 : vector<8x128xi1> to vector<8x128xi8>
    %c0_43 = arith.constant 0 : index
    %c0_44 = arith.constant 0 : index
    %108 = vector.load %arg3[%c0_43, %c0_44] : memref<8x128xi8, #tpu.memory_space<vmem>>, vector<8x128xi8>
    tpu.vector_store %arg3[%c0_43, %c0_44], %107 {strides = array<i32>} : memref<8x128xi8, #tpu.memory_space<vmem>>, vector<8x128xi8>,
    return
  }
  func.func @transform_0(%arg0: i32) -> (i32, i32, i32) {
    %c0_i32 = arith.constant 0 : i32
    %c0_i32_0 = arith.constant 0 : i32
    %c0_i32_1 = arith.constant 0 : i32
    return %c0_i32, %arg0, %c0_i32_0 : i32, i32, i32
  }
  func.func @transform_1(%arg0: i32) -> (i32, i32) {
    %c0_i32 = arith.constant 0 : i32
    %c0_i32_0 = arith.constant 0 : i32
    return %arg0, %c0_i32 : i32, i32
  }
  func.func @transform_2(%arg0: i32) -> (i32, i32) {
    %c0_i32 = arith.constant 0 : i32
    %c0_i32_0 = arith.constant 0 : i32
    return %arg0, %c0_i32 : i32, i32
  }
}

</mosaic_0001>

<bundles_post_ra>
// kernel: tpu_custom_call.1
= control target key start
LH: loop header
LB: loop body
LE: loop exit
PB: predicated region body
PF: predicated region fallthrough
CT: control target
= control target key end

     0   :  { %8 = vsyncpa [#allocation3], 0  ;;  %s291_s0 = inlined_call_operand.hbm [shape: f32[12,8,128], index: 0, kind: input, shape index: {}]   ;;  %s292_s1 = inlined_call_operand.hbm [shape: f32[8,128], index: 1, kind: output, shape index: {0}]   ;;  %s293_s2 = inlined_call_operand.hbm [shape: s8[8,128], index: 2, kind: output, shape index: {1}]  }
   0x1   :  { %9 = vsyncpa [#allocation4], 0 }
   0x2   :  { %10 = vsyncpa [#allocation7], 0  ;;  %s227_s9 = smov [#allocation2]   ;;  %s155_s13 = scalar_lea.hbm %s291_s0, 1536 }
   0x3   :  { %s16_s10 = sshll.u32 %s227_s9, 4  ;;  %p156_p0 = scmp.ne.s32.totalorder %s291_s0, %s155_s13  ;;  %s17_s10 = int_to_ptr.vmem [resolvable:$true] %s16_s10 }
   0x4   :  { %p159_p1 = scmp.lt.u32.totalorder %s155_s13, %s291_s0 }
   0x6   :  { %p161_p2 = pnand %p159_p1, %p156_p0 }
   0x8   :  { %164 = shalt.err (!%p161_p2)
}
   0x9   :  { %s165_s18 = scalar_lea.vmem %s17_s10, 1536  ;;  %p170_p4 = scmp.lt.s32.totalorder %s17_s10, %s17_s10 }
   0xa   :  { %p166_p3 = scmp.ne.s32.totalorder %s17_s10, %s165_s18  ;;  %p171_p5 = scmp.lt.s32.totalorder %s165_s18, %s165_s18 }
   0xc   :  { %p172_p6 = por %p171_p5, %p170_p4 }
   0xe   :  { %p173_p7 = pnand %p172_p6, %p166_p3 }
  0x10   :  { %176 = shalt.err (!%p173_p7)
}
  0x11   :  { %s228_s19 = smov 128   ;;  %s229_s20 = smov 8  }
  0x12   :  { %22 = dma.hbm_to_vmem [thread:$0]  %s291_s0, 1536, %s17_s10, [#allocation3], %s228_s19, %s228_s19, %s229_s20  }
  0x13   :  { %221 = dma.done.wait [#allocation3], 1536  }
  0x14   :  { %222 = vsyncadd [#allocation3], 4294965760  ;;  %v29_v0 = vld [vmem:[#allocation2 + $0x40] sm:$0xff]  ;;  %v31_v1 = vld [vmem:[#allocation2 + $0x48] sm:$0xff]  ;;  %s230_s0 = smov [#allocation5]   ;;  %s231_s24 = smov [#allocation6]  }
  0x15   :  { %v33_v2 = vld [vmem:[#allocation2 + $0x50] sm:$0xff]  ;;  %v35_v3 = vld [vmem:[#allocation2 + $0x58] sm:$0xff]  ;;  %v46_v5 = vld [vmem:[#allocation2] sm:$0xff]  ;;  %s122_s23 = sshll.u32 %s230_s0, 4  ;;  %s132_s25 = sshll.u32 %s231_s24, 4  ;;  %s123_s23 = int_to_ptr.vmem [resolvable:$true] %s122_s23  ;;  %s260_s25 = int_to_ptr.vmem [resolvable:$true] %s132_s25 }
  0x16   :  { %v36_v4 = vmul.f32 0.5, %v33_v2  ;;  %v48_v6 = vld [vmem:[#allocation2 + $0x8] sm:$0xff]  ;;  %v38_v7 = vmul.f32 0.5, %v35_v3  ;;  %v50_v8 = vld [vmem:[#allocation2 + $0x10] sm:$0xff]  ;;  %v52_v9 = vld [vmem:[#allocation2 + $0x18] sm:$0xff]  ;;  %s177_s26 = scalar_lea.vmem %s123_s23, 128  ;;  %p182_p9 = scmp.lt.s32.totalorder %s123_s23, %s123_s23 }
  0x17   :  { %v78_v10 = vld [vmem:[#allocation2 + $0x20] sm:$0xff]  ;;  %v53_v13 = vmul.f32 0.5, %v50_v8  ;;  %v55_v14 = vmul.f32 0.5, %v52_v9  ;;  %v80_v15 = vld [vmem:[#allocation2 + $0x28] sm:$0xff]  ;;  %v82_v16 = vld [vmem:[#allocation2 + $0x30] sm:$0xff]  ;;  %p178_p8 = scmp.ne.s32.totalorder %s123_s23, %s177_s26  ;;  %p183_p10 = scmp.lt.s32.totalorder %s177_s26, %s177_s26 }
  0x18   :  { %v37_v11 = vsub.f32 %v29_v0, %v36_v4  ;;  %v40_v12 = vadd.f32 %v36_v4, %v29_v0  ;;  %v84_v17 = vld [vmem:[#allocation2 + $0x38] sm:$0xff]  ;;  %v39_v18 = vsub.f32 %v31_v1, %v38_v7  ;;  %v41_v19 = vadd.f32 %v38_v7, %v31_v1 }
  0x19   :  { %v85_v20 = vmul.f32 0.5, %v82_v16  ;;  %v87_v21 = vmul.f32 0.5, %v84_v17  ;;  %v54_v23 = vsub.f32 %v46_v5, %v53_v13  ;;  %v56_v24 = vsub.f32 %v48_v6, %v55_v14  ;;  %p184_p11 = por %p183_p10, %p182_p9 }
  0x1a   :  { %v42_v22 = vsub.f32 %v40_v12, %v37_v11  ;;  %v57_v25 = vadd.f32 %v53_v13, %v46_v5  ;;  %v43_v26 = vsub.f32 %v41_v19, %v39_v18  ;;  %v58_v27 = vadd.f32 %v55_v14, %v48_v6 }
  0x1b   :  { %v86_v28 = vsub.f32 %v78_v10, %v85_v20  ;;  %v88_v29 = vsub.f32 %v80_v15, %v87_v21  ;;  %v59_v30 = vmax.f32 %v54_v23, %v37_v11  ;;  %v60_v31 = vmax.f32 %v56_v24, %v39_v18  ;;  %p185_p12 = pnand %p184_p11, %p178_p8 }
  0x1c   :  { %v61_v32 = vmin.f32 %v57_v25, %v40_v12  ;;  %v68_v33 = vsub.f32 %v57_v25, %v54_v23  ;;  %v44_v34 = vmul.f32 %v43_v26, %v42_v22  ;;  %v62_v35 = vmin.f32 %v58_v27, %v41_v19 }
  0x1d   :  { %v69_v36 = vsub.f32 %v58_v27, %v56_v24  ;;  %v89_v37 = vadd.f32 %v85_v20, %v78_v10  ;;  %v90_v39 = vadd.f32 %v87_v21, %v80_v15  ;;  %v91_v40 = vmax.f32 %v86_v28, %v37_v11 }
  0x1e   :  { %v63_v38 = vsub.f32 %v61_v32, %v59_v30  ;;  %v92_v41 = vmax.f32 %v88_v29, %v39_v18  ;;  %v45_v42 = vand.u32 2147483647, %v44_v34  ;;  %v65_v43 = vsub.f32 %v62_v35, %v60_v31 }
  0x1f   :  { %v70_v44 = vmul.f32 %v69_v36, %v68_v33  ;;  %v93_v45 = vmin.f32 %v89_v37, %v40_v12  ;;  %v94_v47 = vmin.f32 %v90_v39, %v41_v19  ;;  %v100_v48 = vsub.f32 %v89_v37, %v86_v28 }
  0x20   :  { %v64_v46 = vmax.f32 %v63_v38, 0.0  ;;  %v101_v49 = vsub.f32 %v90_v39, %v88_v29  ;;  %v66_v50 = vmax.f32 %v65_v43, 0.0  ;;  %v232_v7 = vmov 0  }
  0x21   :  { %v71_v51 = vand.u32 2147483647, %v70_v44  ;;  %v95_v52 = vsub.f32 %v93_v45, %v91_v40  ;;  %v97_v53 = vsub.f32 %v94_v47, %v92_v41 }
  0x22   :  { %v102_v54 = vmul.f32 %v101_v49, %v100_v48  ;;  %v67_v55 = vmul.f32 %v66_v50, %v64_v46 }
  0x23   :  { %v72_v56 = vadd.f32 %v71_v51, %v45_v42  ;;  %v96_v57 = vmax.f32 %v95_v52, 0.0  ;;  %v98_v58 = vmax.f32 %v97_v53, 0.0 }
  0x24   :  { %v103_v59 = vand.u32 2147483647, %v102_v54 }
  0x25   :  { %v73_v60 = vsub.f32 %v72_v56, %v67_v55  ;;  %v99_v61 = vmul.f32 %v98_v58, %v96_v57 }
  0x26   :  { %v104_v62 = vadd.f32 %v103_v59, %v45_v42 }
  0x27   :  { %v74_v63 = vadd.f32 1e-06, %v73_v60 }
  0x28   :  { %v105_v0 = vsub.f32 %v104_v62, %v99_v61 }
  0x29   :  { %151 = vrcp.f32 %v74_v63 }
  0x2a   :  { %v106_v1 = vadd.f32 1e-06, %v105_v0 }
  0x2c   :  { %153 = vrcp.f32 %v106_v1 }
  0x33   :  { %v152_v2 = vpop.eup %151 }
  0x34   :  { %v76_v3 = vmul.f32 %v152_v2, %v67_v55 }
  0x36   :  { %v154_v4 = vpop.eup %153 }
  0x37   :  { %v108_v5 = vmul.f32 %v154_v4, %v99_v61 }
  0x39   :  { %vm109_vm0 = vcmp.gt.f32.partialorder %v108_v5, %v76_v3 }
  0x3a   :  { %v110_v6 = vsel %vm109_vm0, %v108_v5, %v76_v3  ;;  %vm112_vm1 = vmpackc.low %vm109_vm0, %vm109_vm0 }
  0x3b   :  { %111 = vst [vmem:[#allocation5] sm:$0xff] %v110_v6  ;;  %vm113_vm2 = vmpackc.even %vm112_vm1, %vm112_vm1 }
  0x3c   :  { %v114_v8 = vsel %vm113_vm2, 16843009, %v232_v7 }
  0x3d   :  { %188 = shalt.err (!%p185_p12)
}
  0x3e   :  { %s189_s29 = scalar_lea.hbm %s292_s1, 128 }
  0x3f   :  { %p190_p13 = scmp.ne.s32.totalorder %s292_s1, %s189_s29  ;;  %p193_p0 = scmp.lt.u32.totalorder %s189_s29, %s292_s1 }
  0x41   :  { %p195_p1 = pnand %p193_p0, %p190_p13 }
  0x43   :  { %198 = shalt.err (!%p195_p1)
}
  0x44   :  { %125 = dma.vmem_to_hbm [thread:$0]  %s123_s23, 128, %s292_s1, [#allocation4]   ;;  %115 = vst [vmem:[#allocation6] sm:$0x3] %v114_v8 }
  0x45   :  { %s199_s8 = scalar_lea.vmem %s260_s25, 32  ;;  %p204_p3 = scmp.lt.s32.totalorder %s260_s25, %s260_s25 }
  0x46   :  { %p200_p2 = scmp.ne.s32.totalorder %s260_s25, %s199_s8  ;;  %p205_p4 = scmp.lt.s32.totalorder %s199_s8, %s199_s8 }
  0x48   :  { %p206_p5 = por %p205_p4, %p204_p3 }
  0x4a   :  { %p207_p6 = pnand %p206_p5, %p200_p2 }
  0x4c   :  { %210 = shalt.err (!%p207_p6)
}
  0x4d   :  { %s211_s11 = scalar_lea.hbm %s293_s2, 32 }
  0x4e   :  { %p212_p7 = scmp.ne.s32.totalorder %s293_s2, %s211_s11  ;;  %p215_p8 = scmp.lt.u32.totalorder %s211_s11, %s293_s2 }
  0x50   :  { %p217_p9 = pnand %p215_p8, %p212_p7 }
  0x52   :  { %220 = shalt.err (!%p217_p9)
}
  0x53   :  { %135 = dma.vmem_to_hbm [thread:$0]  %s260_s25, 32, %s293_s2, [#allocation7]  }
  0x54   :  { %223 = dma.done.wait [#allocation4], 128  }
  0x55   :  { %224 = vsyncadd [#allocation4], 4294967168 }
  0x56   :  { %225 = dma.done.wait [#allocation7], 32  }
  0x57   :  { %226 = vsyncadd [#allocation7], 4294967264 }
  0x58   :  { %142 = vsyncpa [#allocation3], 1 }
  0x59   :  { %143 = vsyncpa [#allocation4], 1 }
  0x5a   :  { %144 = vsyncpa [#allocation7], 1 }

</bundles_post_ra>
